<compile_context>
chip_gen: v7x
topology: tpu7x:2x2x1
jax: 0.10.0
libtpu: 0.0.40
codegen_flags: <defaults>
</compile_context>

<pallas_src>
import functools

import jax
import jax.numpy as jnp
from jax.experimental import pallas as pl
from jax.experimental.pallas import tpu as pltpu


def _round_up(x, m):
    return (x + m - 1) // m * m


def small_expert_kernel(x_ref, wgu_ref, wd_ref, o_ref, *, r_pad):
    # x_ref:   (tm, hidden)        tile of tokens (compute dtype)
    # wgu_ref: (hidden, 2*r_pad)   [gate_proj.T | up_proj.T], zero-padded to lane width
    # wd_ref:  (r_pad, hidden)     down_proj.T, zero-padded rows
    # o_ref:   (tm, hidden)
    x = x_ref[...]
    # Fused gate+up projection, f32 accumulation on the MXU.
    gu = jnp.dot(x, wgu_ref[...], preferred_element_type=jnp.float32)
    g = gu[:, :r_pad]
    u = gu[:, r_pad:]
    # SiLU epilogue in f32 (v5e has no bf16 VPU/EUP path); silu(0)*0 == 0 on padded cols.
    h = (g * jax.nn.sigmoid(g)) * u
    out = jnp.dot(h.astype(wd_ref.dtype), wd_ref[...],
                  preferred_element_type=jnp.float32)
    o_ref[...] = out.astype(o_ref.dtype)


def _build_call(*, T_pad, tm, hidden, r_pad, out_dtype, single_buffer_weights,
                vmem_limit_bytes, cost_estimate):
    kernel = functools.partial(small_expert_kernel, r_pad=r_pad)
    w_kwargs = {}
    if single_buffer_weights:
        # Constant index_map -> weights are resident across the whole grid; no need
        # to double-buffer them (halves weight VMEM, freeing room for a bigger tm).
        w_kwargs = dict(pipeline_mode=pl.Buffered(1))
    in_specs = [
        pl.BlockSpec((tm, hidden), lambda i: (i, 0)),
        pl.BlockSpec((hidden, 2 * r_pad), lambda i: (0, 0), **w_kwargs),
        pl.BlockSpec((r_pad, hidden), lambda i: (0, 0), **w_kwargs),
    ]
    return pl.pallas_call(
        kernel,
        out_shape=jax.ShapeDtypeStruct((T_pad, hidden), out_dtype),
        grid_spec=pltpu.PrefetchScalarGridSpec(
            num_scalar_prefetch=0,
            grid=(T_pad // tm,),
            in_specs=in_specs,
            out_specs=pl.BlockSpec((tm, hidden), lambda i: (i, 0)),
        ),
        compiler_params=pltpu.CompilerParams(
            dimension_semantics=("parallel",),  # token tiles shard across TCs on v7x
            vmem_limit_bytes=vmem_limit_bytes,
        ),
        cost_estimate=cost_estimate,
    )


def small_expert(x, gate_w, up_w, down_w, *, tm=256, compute_dtype=None):
    """SwiGLU expert forward.

    x:       [..., hidden]
    gate_w:  [r, hidden]   (nn.Linear weight layout)
    up_w:    [r, hidden]
    down_w:  [hidden, r]
    """
    out_dtype = x.dtype
    if compute_dtype is None:
        compute_dtype = x.dtype
    compute_dtype = jnp.dtype(compute_dtype)

    hidden = x.shape[-1]
    r = gate_w.shape[0]

    # Pad r up to a lane multiple so intermediates are lane-dense.  Padded gate/up
    # columns are zero -> silu(0)*0 = 0; padded down-proj rows are zero -> exact output.
    r_pad = _round_up(r, 128)

    wgu = jnp.zeros((hidden, 2 * r_pad), compute_dtype)
    wgu = wgu.at[:, :r].set(gate_w.T.astype(compute_dtype))
    wgu = wgu.at[:, r_pad:r_pad + r].set(up_w.T.astype(compute_dtype))
    wd = jnp.zeros((r_pad, hidden), compute_dtype)
    wd = wd.at[:r, :].set(down_w.T.astype(compute_dtype))

    x2 = x.reshape(-1, hidden).astype(compute_dtype)
    T = x2.shape[0]

    # Token tile: multiple of 16 (bf16 sublane packing), no larger than needed.
    tm_eff = _round_up(max(16, min(tm, _round_up(T, 16))), 16)
    T_pad = _round_up(T, tm_eff)
    if T_pad != T:
        x2 = jnp.pad(x2, ((0, T_pad - T), (0, 0)))

    itemsize = compute_dtype.itemsize
    out_itemsize = jnp.dtype(out_dtype).itemsize
    # Conservative VMEM budget (assumes double-buffered weights) + headroom,
    # clamped to a value that is safe on v5e/v6e (128 MiB) and v7x (64 MiB).
    est = (2 * tm_eff * hidden * itemsize                      # x tiles (double buffered)
           + 2 * tm_eff * hidden * out_itemsize                # out tiles
           + 2 * (hidden * 2 * r_pad + r_pad * hidden) * itemsize  # weights
           + tm_eff * 3 * r_pad * 4)                           # f32 intermediates gu, h
    vmem_limit = int(min(max(int(est * 1.5) + (2 << 20), 32 << 20), 60 << 20))

    cost = pl.CostEstimate(
        flops=6 * T_pad * hidden * r_pad,
        transcendentals=T_pad * r_pad,
        bytes_accessed=(T_pad * hidden * itemsize
                        + (hidden * 2 * r_pad + r_pad * hidden) * itemsize
                        + T_pad * hidden * out_itemsize),
    )

    common = dict(T_pad=T_pad, tm=tm_eff, hidden=hidden, r_pad=r_pad,
                  out_dtype=out_dtype, vmem_limit_bytes=vmem_limit,
                  cost_estimate=cost)
    try:
        out = _build_call(single_buffer_weights=True, **common)(x2, wgu, wd)
        out = jax.block_until_ready(out)
    except Exception:
        # pl.Buffered(1) on a top-level pallas_call BlockSpec is not supported on
        # every jax version; fall back to default double-buffered weights.
        out = _build_call(single_buffer_weights=False, **common)(x2, wgu, wd)
        out = jax.block_until_ready(out)

    return out[:T].reshape(x.shape)


def reference(x, gate_w, up_w, down_w):
    g = x @ gate_w.T
    u = x @ up_w.T
    return (jax.nn.silu(g) * u) @ down_w.T


if __name__ == "__main__":
    key = jax.random.PRNGKey(0)

    # --- test 1: shapes matching SmallExpert(hidden_size=32, r=16), f32 path ---
    batch, seq, hidden, r = 2, 8, 32, 16
    k0, k1, k2, k3 = jax.random.split(key, 4)
    x = jax.random.normal(k0, (batch, seq, hidden), dtype=jnp.float32)
    bound_gu = 1.0 / (hidden ** 0.5)
    bound_d = 1.0 / (r ** 0.5)
    gate_w = jax.random.uniform(k1, (r, hidden), minval=-bound_gu, maxval=bound_gu,
                                dtype=jnp.float32)
    up_w = jax.random.uniform(k2, (r, hidden), minval=-bound_gu, maxval=bound_gu,
                              dtype=jnp.float32)
    down_w = jax.random.uniform(k3, (hidden, r), minval=-bound_d, maxval=bound_d,
                                dtype=jnp.float32)

    out = jax.block_until_ready(small_expert(x, gate_w, up_w, down_w))
    ref = reference(x, gate_w, up_w, down_w)
    assert out.shape == x.shape
    assert jnp.allclose(out, ref, atol=1e-5, rtol=1e-5), "f32 mismatch vs reference"

    # --- test 2: bf16 MXU inputs (f32 accumulation) on the same data ---
    out_bf16 = jax.block_until_ready(
        small_expert(x, gate_w, up_w, down_w, compute_dtype=jnp.bfloat16))
    assert out_bf16.dtype == x.dtype
    assert jnp.allclose(out_bf16, ref, atol=1e-1, rtol=1e-1), "bf16 mismatch vs reference"

    # --- test 3: larger token count exercising padding + multi-step parallel grid ---
    kx = jax.random.fold_in(key, 7)
    batch2, seq2, hidden2, r2 = 4, 96, 128, 32
    ka, kb, kc, kd = jax.random.split(kx, 4)
    x_big = jax.random.normal(ka, (batch2, seq2, hidden2), dtype=jnp.float32)
    b_gu2 = 1.0 / (hidden2 ** 0.5)
    b_d2 = 1.0 / (r2 ** 0.5)
    gw2 = jax.random.uniform(kb, (r2, hidden2), minval=-b_gu2, maxval=b_gu2,
                             dtype=jnp.float32)
    uw2 = jax.random.uniform(kc, (r2, hidden2), minval=-b_gu2, maxval=b_gu2,
                             dtype=jnp.float32)
    dw2 = jax.random.uniform(kd, (hidden2, r2), minval=-b_d2, maxval=b_d2,
                             dtype=jnp.float32)
    out2 = jax.block_until_ready(small_expert(x_big, gw2, uw2, dw2, tm=256))
    ref2 = reference(x_big, gw2, uw2, dw2)
    assert out2.shape == x_big.shape
    assert jnp.allclose(out2, ref2, atol=1e-4, rtol=1e-4), "mismatch vs reference (test 3)"

    print("KERNEL_OK")
</pallas_src>

<mosaic_0001>
module attributes {stable_mosaic.version = 11 : i64} {
  func.func @small_expert_kernel(%arg0: i32, %arg1: memref<16x32xf32, #tpu.memory_space<vmem>>, %arg2: memref<32x256xf32, #tpu.memory_space<vmem>>, %arg3: memref<128x32xf32, #tpu.memory_space<vmem>>, %arg4: memref<16x32xf32, #tpu.memory_space<vmem>>) attributes {dimension_semantics = [#tpu.dimension_semantics<parallel>], iteration_bounds = array<i64: 1>, scalar_prefetch = 0 : i64, scratch_operands = 0 : i64, tpu.core_type = #tpu.core_type<tc>, window_params = [{transform_indices = @transform_0, window_bounds = array<i64: 16, 32>}, {pipeline_mode = #tpu.pipeline_mode<synchronous>, transform_indices = @transform_1, window_bounds = array<i64: 32, 256>}, {pipeline_mode = #tpu.pipeline_mode<synchronous>, transform_indices = @transform_2, window_bounds = array<i64: 128, 32>}, {transform_indices = @transform_3, window_bounds = array<i64: 16, 32>}]} {
    %c0 = arith.constant 0 : index
    %c0_0 = arith.constant 0 : index
    %0 = vector.load %arg1[%c0, %c0_0] : memref<16x32xf32, #tpu.memory_space<vmem>>, vector<16x32xf32>
    %c0_1 = arith.constant 0 : index
    %c0_2 = arith.constant 0 : index
    %1 = vector.load %arg2[%c0_1, %c0_2] : memref<32x256xf32, #tpu.memory_space<vmem>>, vector<32x256xf32>
    %cst = arith.constant dense<0.000000e+00> : vector<16x256xf32>
    %2 = tpu.matmul %0, %1, %cst {dimension_numbers = #tpu.dot_dimension_numbers<[1], [0], [0], [1], [0, 0, 1, 1], [], []>} : vector<16x32xf32>, vector<32x256xf32>, vector<16x256xf32> -> vector<16x256xf32>
    %3 = vector.extract_strided_slice %2 {offsets = [0, 0], sizes = [16, 128], strides = [1, 1]} : vector<16x256xf32> to vector<16x128xf32>
    %4 = vector.extract_strided_slice %2 {offsets = [0, 128], sizes = [16, 128], strides = [1, 1]} : vector<16x256xf32> to vector<16x128xf32>
    %5 = arith.negf %3 : vector<16x128xf32>
    %6 = math.exp %5 : vector<16x128xf32>
    %cst_3 = arith.constant 1.000000e+00 : f32
    %7 = vector.broadcast %cst_3 : f32 to vector<16x128xf32>
    %8 = arith.addf %7, %6 : vector<16x128xf32>
    %9 = arith.divf %7, %8 : vector<16x128xf32>
    %10 = arith.mulf %3, %9 : vector<16x128xf32>
    %11 = arith.mulf %10, %4 : vector<16x128xf32>
    %c0_4 = arith.constant 0 : index
    %c0_5 = arith.constant 0 : index
    %12 = vector.load %arg3[%c0_4, %c0_5] : memref<128x32xf32, #tpu.memory_space<vmem>>, vector<128x32xf32>
    %cst_6 = arith.constant dense<0.000000e+00> : vector<16x32xf32>
    %13 = tpu.matmul %11, %12, %cst_6 {dimension_numbers = #tpu.dot_dimension_numbers<[1], [0], [0], [1], [0, 0, 1, 1], [], []>} : vector<16x128xf32>, vector<128x32xf32>, vector<16x32xf32> -> vector<16x32xf32>
    %c0_7 = arith.constant 0 : index
    %c0_8 = arith.constant 0 : index
    %14 = vector.load %arg4[%c0_7, %c0_8] : memref<16x32xf32, #tpu.memory_space<vmem>>, vector<16x32xf32>
    tpu.vector_store %arg4[%c0_7, %c0_8], %13 {strides = array<i32>} : memref<16x32xf32, #tpu.memory_space<vmem>>, vector<16x32xf32>,
    return
  }
  func.func @transform_0(%arg0: i32) -> (i32, i32) {
    %c0_i32 = arith.constant 0 : i32
    %c0_i32_0 = arith.constant 0 : i32
    return %arg0, %c0_i32 : i32, i32
  }
  func.func @transform_1(%arg0: i32) -> (i32, i32) {
    %c0_i32 = arith.constant 0 : i32
    %c0_i32_0 = arith.constant 0 : i32
    %c0_i32_1 = arith.constant 0 : i32
    return %c0_i32, %c0_i32_0 : i32, i32
  }
  func.func @transform_2(%arg0: i32) -> (i32, i32) {
    %c0_i32 = arith.constant 0 : i32
    %c0_i32_0 = arith.constant 0 : i32
    %c0_i32_1 = arith.constant 0 : i32
    return %c0_i32, %c0_i32_0 : i32, i32
  }
  func.func @transform_3(%arg0: i32) -> (i32, i32) {
    %c0_i32 = arith.constant 0 : i32
    %c0_i32_0 = arith.constant 0 : i32
    return %arg0, %c0_i32 : i32, i32
  }
}

module attributes {stable_mosaic.version = 11 : i64} {
  func.func @small_expert_kernel(%arg0: i32, %arg1: memref<16x32xf32, #tpu.memory_space<vmem>>, %arg2: memref<32x256xf32, #tpu.memory_space<vmem>>, %arg3: memref<128x32xf32, #tpu.memory_space<vmem>>, %arg4: memref<16x32xf32, #tpu.memory_space<vmem>>) attributes {dimension_semantics = [#tpu.dimension_semantics<parallel>], iteration_bounds = array<i64: 1>, scalar_prefetch = 0 : i64, scratch_operands = 0 : i64, tpu.core_type = #tpu.core_type<tc>, window_params = [{transform_indices = @transform_0, window_bounds = array<i64: 16, 32>}, {pipeline_mode = #tpu.pipeline_mode<synchronous>, transform_indices = @transform_1, window_bounds = array<i64: 32, 256>}, {pipeline_mode = #tpu.pipeline_mode<synchronous>, transform_indices = @transform_2, window_bounds = array<i64: 128, 32>}, {transform_indices = @transform_3, window_bounds = array<i64: 16, 32>}]} {
    %c0 = arith.constant 0 : index
    %c0_0 = arith.constant 0 : index
    %0 = vector.load %arg1[%c0, %c0_0] : memref<16x32xf32, #tpu.memory_space<vmem>>, vector<16x32xf32>
    %c0_1 = arith.constant 0 : index
    %c0_2 = arith.constant 0 : index
    %1 = vector.load %arg2[%c0_1, %c0_2] : memref<32x256xf32, #tpu.memory_space<vmem>>, vector<32x256xf32>
    %cst = arith.constant dense<0.000000e+00> : vector<16x256xf32>
    %2 = tpu.matmul %0, %1, %cst {dimension_numbers = #tpu.dot_dimension_numbers<[1], [0], [0], [1], [0, 0, 1, 1], [], []>} : vector<16x32xf32>, vector<32x256xf32>, vector<16x256xf32> -> vector<16x256xf32>
    %3 = vector.extract_strided_slice %2 {offsets = [0, 0], sizes = [16, 128], strides = [1, 1]} : vector<16x256xf32> to vector<16x128xf32>
    %4 = vector.extract_strided_slice %2 {offsets = [0, 128], sizes = [16, 128], strides = [1, 1]} : vector<16x256xf32> to vector<16x128xf32>
    %5 = arith.negf %3 : vector<16x128xf32>
    %6 = math.exp %5 : vector<16x128xf32>
    %cst_3 = arith.constant 1.000000e+00 : f32
    %7 = vector.broadcast %cst_3 : f32 to vector<16x128xf32>
    %8 = arith.addf %7, %6 : vector<16x128xf32>
    %9 = arith.divf %7, %8 : vector<16x128xf32>
    %10 = arith.mulf %3, %9 : vector<16x128xf32>
    %11 = arith.mulf %10, %4 : vector<16x128xf32>
    %c0_4 = arith.constant 0 : index
    %c0_5 = arith.constant 0 : index
    %12 = vector.load %arg3[%c0_4, %c0_5] : memref<128x32xf32, #tpu.memory_space<vmem>>, vector<128x32xf32>
    %cst_6 = arith.constant dense<0.000000e+00> : vector<16x32xf32>
    %13 = tpu.matmul %11, %12, %cst_6 {dimension_numbers = #tpu.dot_dimension_numbers<[1], [0], [0], [1], [0, 0, 1, 1], [], []>} : vector<16x128xf32>, vector<128x32xf32>, vector<16x32xf32> -> vector<16x32xf32>
    %c0_7 = arith.constant 0 : index
    %c0_8 = arith.constant 0 : index
    %14 = vector.load %arg4[%c0_7, %c0_8] : memref<16x32xf32, #tpu.memory_space<vmem>>, vector<16x32xf32>
    tpu.vector_store %arg4[%c0_7, %c0_8], %13 {strides = array<i32>} : memref<16x32xf32, #tpu.memory_space<vmem>>, vector<16x32xf32>,
    return
  }
  func.func @transform_0(%arg0: i32) -> (i32, i32) {
    %c0_i32 = arith.constant 0 : i32
    %c0_i32_0 = arith.constant 0 : i32
    return %arg0, %c0_i32 : i32, i32
  }
  func.func @transform_1(%arg0: i32) -> (i32, i32) {
    %c0_i32 = arith.constant 0 : i32
    %c0_i32_0 = arith.constant 0 : i32
    %c0_i32_1 = arith.constant 0 : i32
    return %c0_i32, %c0_i32_0 : i32, i32
  }
  func.func @transform_2(%arg0: i32) -> (i32, i32) {
    %c0_i32 = arith.constant 0 : i32
    %c0_i32_0 = arith.constant 0 : i32
    %c0_i32_1 = arith.constant 0 : i32
    return %c0_i32, %c0_i32_0 : i32, i32
  }
  func.func @transform_3(%arg0: i32) -> (i32, i32) {
    %c0_i32 = arith.constant 0 : i32
    %c0_i32_0 = arith.constant 0 : i32
    return %arg0, %c0_i32 : i32, i32
  }
}

</mosaic_0001>

<bundles_post_ra>
// kernel: tpu_custom_call.1
= control target key start
LH: loop header
LB: loop body
LE: loop exit
PB: predicated region body
PF: predicated region fallthrough
CT: control target
= control target key end

     0   :  { %v367_v7 = vmov 0.0   ;;  %s485_s0 = inlined_call_operand.vmem [shape: f32[16,32], index: 0, kind: input, shape index: {}]   ;;  %s486_s1 = inlined_call_operand.vmem [shape: f32[32,256], index: 1, kind: input, shape index: {}]   ;;  %s487_s2 = inlined_call_operand.vmem [shape: f32[128,32], index: 2, kind: input, shape index: {}]   ;;  %s488_s3 = inlined_call_operand.hbm [shape: f32[16,32], index: 3, kind: output, shape index: {}]  }
   0x1   :  { %v18_v0 = vld [vmem:[%s486_s1 + $0x8] sm:$0xff]  ;;  %v20_v1 = vld [vmem:[%s486_s1 + $0x18] sm:$0xff]  ;;  %v17_v2 = vld [vmem:[%s486_s1] sm:$0xff]  ;;  %96 = vmatprep.mubr.f32.mxu0 %v367_v7 }
   0x2   :  { %v291_v3 = vpack.c.bf16 %v20_v1, %v18_v0  ;;  %v19_v4 = vld [vmem:[%s486_s1 + $0x10] sm:$0xff]  ;;  %v22_v5 = vld [vmem:[%s486_s1 + $0x28] sm:$0xff]  ;;  %v24_v6 = vld [vmem:[%s486_s1 + $0x38] sm:$0xff] }
   0x3   :  { %v293_v8 = vpack.c.bf16 %v19_v4, %v17_v2  ;;  %v295_v9 = vpack.c.bf16 %v24_v6, %v22_v5  ;;  %v21_v10 = vld [vmem:[%s486_s1 + $0x20] sm:$0xff]  ;;  %v23_v11 = vld [vmem:[%s486_s1 + $0x30] sm:$0xff] }
   0x4   :  { %292 = vmatprep.subr.bf16.mxu0 %v291_v3 }
   0x5   :  { %8 = vsyncpa [#allocation3], 0  ;;  %294 = vmatpush1.bf16.msra.mxu0 %v293_v8  ;;  %v297_v12 = vpack.c.bf16 %v23_v11, %v21_v10  ;;  %v15_v13 = vld [vmem:[%s485_s0] sm:$0xff]  ;;  %vm25_vm0 = vcmask 261120   ;;  %v16_v14 = vld [vmem:[%s485_s0 + $0x8] sm:$0xff] }
   0x6   :  { %296 = vmatprep.subr.bf16.mxu0 %v295_v9  ;;  %v125_v15 = vld [vmem:[%s487_s2] sm:$0xff]  ;;  %v126_v16 = vld [vmem:[%s487_s2 + $0x8] sm:$0xff]  ;;  %v127_v18 = vld [vmem:[%s487_s2 + $0x10] sm:$0xff] }
   0x7   :  { %v299_v17 = vpack.c.bf16 %v126_v16, %v125_v15  ;;  %v128_v19 = vld [vmem:[%s487_s2 + $0x18] sm:$0xff]  ;;  %v129_v21 = vld [vmem:[%s487_s2 + $0x20] sm:$0xff]  ;;  %v130_v22 = vld [vmem:[%s487_s2 + $0x28] sm:$0xff] }
   0x8   :  { %v303_v20 = vpack.c.bf16 %v128_v19, %v127_v18  ;;  %v307_v23 = vpack.c.bf16 %v130_v22, %v129_v21  ;;  %v131_v24 = vld [vmem:[%s487_s2 + $0x30] sm:$0xff]  ;;  %v132_v25 = vld [vmem:[%s487_s2 + $0x38] sm:$0xff]  ;;  %v133_v27 = vld [vmem:[%s487_s2 + $0x40] sm:$0xff] }
   0x9   :  { %298 = vmatpush1.bf16.msra.mxu0 %v297_v12  ;;  %300 = vmatprep.subr.bf16.mxu1 %v299_v17  ;;  %v311_v26 = vpack.c.bf16 %v132_v25, %v131_v24  ;;  %v134_v28 = vld [vmem:[%s487_s2 + $0x48] sm:$0xff]  ;;  %v135_v30 = vld [vmem:[%s487_s2 + $0x50] sm:$0xff]  ;;  %v136_v31 = vld [vmem:[%s487_s2 + $0x58] sm:$0xff] }
   0xa   :  { %302 = vmatpush3.bf16.msra.mxu1 %v299_v17  ;;  %v315_v29 = vpack.c.bf16 %v134_v28, %v133_v27  ;;  %v319_v32 = vpack.c.bf16 %v136_v31, %v135_v30  ;;  %v137_v33 = vld [vmem:[%s487_s2 + $0x60] sm:$0xff]  ;;  %v138_v34 = vld [vmem:[%s487_s2 + $0x68] sm:$0xff]  ;;  %v139_v36 = vld [vmem:[%s487_s2 + $0x70] sm:$0xff] }
   0xb   :  { %304 = vmatprep.subr.bf16.mxu1 %v303_v20  ;;  %v323_v35 = vpack.c.bf16 %v138_v34, %v137_v33  ;;  %v140_v37 = vld [vmem:[%s487_s2 + $0x78] sm:$0xff]  ;;  %s368_s2 = smov [#allocation2]  }
   0xc   :  { %234 = vmatmul.mubr.msk.f32.vlgmr.msra.gmra.mrb[0].mxu0 %vm25_vm0, %v15_v13  ;;  %v327_v38 = vpack.c.bf16 %v140_v37, %v139_v36  ;;  %s223_s7 = sshll.u32 %s368_s2, 4  ;;  %s224_s7 = int_to_ptr.vmem [resolvable:$true] %s223_s7 }
   0xd   :  { %102 = vmatprep.mubr.f32.mxu0 %v367_v7  ;;  %s343_s8 = scalar_lea.vmem %s224_s7, 256  ;;  %p348_p1 = scmp.lt.s32.totalorder %s224_s7, %s224_s7 }
   0xe   :  { %306 = vmatpush3.bf16.msra.mxu1 %v303_v20  ;;  %p344_p0 = scmp.ne.s32.totalorder %s224_s7, %s343_s8  ;;  %p349_p2 = scmp.lt.s32.totalorder %s343_s8, %s343_s8 }
   0xf   :  { %308 = vmatprep.subr.bf16.mxu1 %v307_v23 }
  0x10   :  { %235 = vmatmul.mubr.msk.f32.gmra.mrb[2].mxu0 %vm25_vm0, %v16_v14  ;;  %p350_p3 = por %p349_p2, %p348_p1 }
  0x12   :  { %310 = vmatpush3.bf16.msra.mxu1 %v307_v23  ;;  %p351_p4 = pnand %p350_p3, %p344_p0 }
  0x13   :  { %312 = vmatprep.subr.bf16.mxu1 %v311_v26 }
  0x16   :  { %314 = vmatpush3.bf16.msra.mxu1 %v311_v26 }
  0x17   :  { %316 = vmatprep.subr.bf16.mxu1 %v315_v29 }
  0x1a   :  { %318 = vmatpush3.bf16.msra.mxu1 %v315_v29 }
  0x1b   :  { %320 = vmatprep.subr.bf16.mxu1 %v319_v32 }
  0x1e   :  { %322 = vmatpush3.bf16.msra.mxu1 %v319_v32 }
  0x1f   :  { %324 = vmatprep.subr.bf16.mxu1 %v323_v35 }
  0x22   :  { %326 = vmatpush3.bf16.msra.mxu1 %v323_v35 }
  0x23   :  { %328 = vmatprep.subr.bf16.mxu1 %v327_v38 }
  0x26   :  { %330 = vmatpush3.bf16.msra.mxu1 %v327_v38 }
  0xdf   :  { %v98_v39 = vpop.f32.mrb[0].mxu0 }
  0xe0   :  { %v236_v40 = vmul.f32 -1.442695, %v98_v39  ;;  %v100_v41 = vpop.f32.mrb[1].mxu0 }
  0xe2   :  { %335 = vpow2.f32 %v236_v40 }
  0xe3   :  { %v104_v42 = vpop.f32.mrb[2].mxu0 }
  0xe4   :  { %v237_v43 = vmul.f32 -1.442695, %v104_v42  ;;  %v106_v44 = vpop.f32.mrb[3].mxu0 }
  0xe6   :  { %337 = vpow2.f32 %v237_v43 }
  0xec   :  { %v336_v45 = vpop.eup %335 }
  0xed   :  { %v115_v46 = vadd.f32 1.0, %v336_v45 }
  0xef   :  { %339 = vrcp.f32 %v115_v46 }
  0xf0   :  { %v338_v47 = vpop.eup %337 }
  0xf1   :  { %v116_v48 = vadd.f32 1.0, %v338_v47 }
  0xf3   :  { %341 = vrcp.f32 %v116_v48 }
  0xf9   :  { %v340_v49 = vpop.eup %339 }
  0xfa   :  { %v121_v50 = vmul.f32 %v340_v49, %v98_v39 }
  0xfc   :  { %v123_v51 = vmul.f32 %v121_v50, %v100_v41 }
  0xfd   :  { %v342_v52 = vpop.eup %341 }
  0xfe   :  { %v122_v53 = vmul.f32 %v342_v52, %v104_v42  ;;  %288 = vmatprep.mubr.f32.mxu1 %v123_v51 }
 0x100   :  { %v124_v54 = vmul.f32 %v122_v53, %v106_v44 }
 0x102   :  { %289 = vmatmul.mubr.f32.vlgmr.msra.gmra.mrb[0].mxu1 %v124_v54 }
 0x1d5   :  { %v290_v55 = vpop.f32.mrb[0].mxu1 }
 0x1d6   :  { %217 = vst.msk [vmem:[#allocation2 + $0x8] sm:$0xff] %vm25_vm0, %v290_v55  ;;  %v207_v56 = vpop.f32.mrb[1].mxu1 }
 0x1d7   :  { %216 = vst.msk [vmem:[#allocation2] sm:$0xff] %vm25_vm0, %v207_v56 }
 0x1d8   :  { %354 = shalt.err (!%p351_p4)
}
 0x1d9   :  { %s355_s11 = scalar_lea.hbm %s488_s3, 256 }
 0x1da   :  { %p356_p5 = scmp.ne.s32.totalorder %s488_s3, %s355_s11  ;;  %p359_p6 = scmp.lt.u32.totalorder %s355_s11, %s488_s3 }
 0x1dc   :  { %p361_p7 = pnand %p359_p6, %p356_p5 }
 0x1de   :  { %364 = shalt.err (!%p361_p7)
}
 0x1df   :  { %s369_s15 = smov 128   ;;  %s370_s16 = smov 8  }
 0x1e0   :  { %229 = dma.vmem_to_hbm [thread:$0]  %s224_s7, 256, %s488_s3, [#allocation3], %s369_s15, %s369_s15, %s370_s16  }
 0x1e1   :  { %365 = dma.done.wait [#allocation3], 256  }
 0x1e2   :  { %366 = vsyncadd [#allocation3], 4294967040 }
 0x1e3   :  { %233 = vsyncpa [#allocation3], 1 }

// kernel: tpu_custom_call.1
= control target key start
LH: loop header
LB: loop body
LE: loop exit
PB: predicated region body
PF: predicated region fallthrough
CT: control target
= control target key end

     0   :  { %v367_v7 = vmov 0.0   ;;  %s485_s0 = inlined_call_operand.vmem [shape: f32[16,32], index: 0, kind: input, shape index: {}]   ;;  %s486_s1 = inlined_call_operand.vmem [shape: f32[32,256], index: 1, kind: input, shape index: {}]   ;;  %s487_s2 = inlined_call_operand.vmem [shape: f32[128,32], index: 2, kind: input, shape index: {}]   ;;  %s488_s3 = inlined_call_operand.hbm [shape: f32[16,32], index: 3, kind: output, shape index: {}]  }
   0x1   :  { %v18_v0 = vld [vmem:[%s486_s1 + $0x8] sm:$0xff]  ;;  %v20_v1 = vld [vmem:[%s486_s1 + $0x18] sm:$0xff]  ;;  %v17_v2 = vld [vmem:[%s486_s1] sm:$0xff]  ;;  %96 = vmatprep.mubr.f32.mxu0 %v367_v7 }
   0x2   :  { %v291_v3 = vpack.c.bf16 %v20_v1, %v18_v0  ;;  %v19_v4 = vld [vmem:[%s486_s1 + $0x10] sm:$0xff]  ;;  %v22_v5 = vld [vmem:[%s486_s1 + $0x28] sm:$0xff]  ;;  %v24_v6 = vld [vmem:[%s486_s1 + $0x38] sm:$0xff] }
   0x3   :  { %v293_v8 = vpack.c.bf16 %v19_v4, %v17_v2  ;;  %v295_v9 = vpack.c.bf16 %v24_v6, %v22_v5  ;;  %v21_v10 = vld [vmem:[%s486_s1 + $0x20] sm:$0xff]  ;;  %v23_v11 = vld [vmem:[%s486_s1 + $0x30] sm:$0xff] }
   0x4   :  { %292 = vmatprep.subr.bf16.mxu0 %v291_v3 }
   0x5   :  { %8 = vsyncpa [#allocation3], 0  ;;  %294 = vmatpush1.bf16.msra.mxu0 %v293_v8  ;;  %v297_v12 = vpack.c.bf16 %v23_v11, %v21_v10  ;;  %v15_v13 = vld [vmem:[%s485_s0] sm:$0xff]  ;;  %vm25_vm0 = vcmask 261120   ;;  %v16_v14 = vld [vmem:[%s485_s0 + $0x8] sm:$0xff] }
   0x6   :  { %296 = vmatprep.subr.bf16.mxu0 %v295_v9  ;;  %v125_v15 = vld [vmem:[%s487_s2] sm:$0xff]  ;;  %v126_v16 = vld [vmem:[%s487_s2 + $0x8] sm:$0xff]  ;;  %v127_v18 = vld [vmem:[%s487_s2 + $0x10] sm:$0xff] }
   0x7   :  { %v299_v17 = vpack.c.bf16 %v126_v16, %v125_v15  ;;  %v128_v19 = vld [vmem:[%s487_s2 + $0x18] sm:$0xff]  ;;  %v129_v21 = vld [vmem:[%s487_s2 + $0x20] sm:$0xff]  ;;  %v130_v22 = vld [vmem:[%s487_s2 + $0x28] sm:$0xff] }
   0x8   :  { %v303_v20 = vpack.c.bf16 %v128_v19, %v127_v18  ;;  %v307_v23 = vpack.c.bf16 %v130_v22, %v129_v21  ;;  %v131_v24 = vld [vmem:[%s487_s2 + $0x30] sm:$0xff]  ;;  %v132_v25 = vld [vmem:[%s487_s2 + $0x38] sm:$0xff]  ;;  %v133_v27 = vld [vmem:[%s487_s2 + $0x40] sm:$0xff] }
   0x9   :  { %298 = vmatpush1.bf16.msra.mxu0 %v297_v12  ;;  %300 = vmatprep.subr.bf16.mxu1 %v299_v17  ;;  %v311_v26 = vpack.c.bf16 %v132_v25, %v131_v24  ;;  %v134_v28 = vld [vmem:[%s487_s2 + $0x48] sm:$0xff]  ;;  %v135_v30 = vld [vmem:[%s487_s2 + $0x50] sm:$0xff]  ;;  %v136_v31 = vld [vmem:[%s487_s2 + $0x58] sm:$0xff] }
   0xa   :  { %302 = vmatpush3.bf16.msra.mxu1 %v299_v17  ;;  %v315_v29 = vpack.c.bf16 %v134_v28, %v133_v27  ;;  %v319_v32 = vpack.c.bf16 %v136_v31, %v135_v30  ;;  %v137_v33 = vld [vmem:[%s487_s2 + $0x60] sm:$0xff]  ;;  %v138_v34 = vld [vmem:[%s487_s2 + $0x68] sm:$0xff]  ;;  %v139_v36 = vld [vmem:[%s487_s2 + $0x70] sm:$0xff] }
   0xb   :  { %304 = vmatprep.subr.bf16.mxu1 %v303_v20  ;;  %v323_v35 = vpack.c.bf16 %v138_v34, %v137_v33  ;;  %v140_v37 = vld [vmem:[%s487_s2 + $0x78] sm:$0xff]  ;;  %s368_s2 = smov [#allocation2]  }
   0xc   :  { %234 = vmatmul.mubr.msk.f32.vlgmr.msra.gmra.mrb[0].mxu0 %vm25_vm0, %v15_v13  ;;  %v327_v38 = vpack.c.bf16 %v140_v37, %v139_v36  ;;  %s223_s7 = sshll.u32 %s368_s2, 4  ;;  %s224_s7 = int_to_ptr.vmem [resolvable:$true] %s223_s7 }
   0xd   :  { %102 = vmatprep.mubr.f32.mxu0 %v367_v7  ;;  %s343_s8 = scalar_lea.vmem %s224_s7, 256  ;;  %p348_p1 = scmp.lt.s32.totalorder %s224_s7, %s224_s7 }
   0xe   :  { %306 = vmatpush3.bf16.msra.mxu1 %v303_v20  ;;  %p344_p0 = scmp.ne.s32.totalorder %s224_s7, %s343_s8  ;;  %p349_p2 = scmp.lt.s32.totalorder %s343_s8, %s343_s8 }
   0xf   :  { %308 = vmatprep.subr.bf16.mxu1 %v307_v23 }
  0x10   :  { %235 = vmatmul.mubr.msk.f32.gmra.mrb[2].mxu0 %vm25_vm0, %v16_v14  ;;  %p350_p3 = por %p349_p2, %p348_p1 }
  0x12   :  { %310 = vmatpush3.bf16.msra.mxu1 %v307_v23  ;;  %p351_p4 = pnand %p350_p3, %p344_p0 }
  0x13   :  { %312 = vmatprep.subr.bf16.mxu1 %v311_v26 }
  0x16   :  { %314 = vmatpush3.bf16.msra.mxu1 %v311_v26 }
  0x17   :  { %316 = vmatprep.subr.bf16.mxu1 %v315_v29 }
  0x1a   :  { %318 = vmatpush3.bf16.msra.mxu1 %v315_v29 }
  0x1b   :  { %320 = vmatprep.subr.bf16.mxu1 %v319_v32 }
  0x1e   :  { %322 = vmatpush3.bf16.msra.mxu1 %v319_v32 }
  0x1f   :  { %324 = vmatprep.subr.bf16.mxu1 %v323_v35 }
  0x22   :  { %326 = vmatpush3.bf16.msra.mxu1 %v323_v35 }
  0x23   :  { %328 = vmatprep.subr.bf16.mxu1 %v327_v38 }
  0x26   :  { %330 = vmatpush3.bf16.msra.mxu1 %v327_v38 }
  0xdf   :  { %v98_v39 = vpop.f32.mrb[0].mxu0 }
  0xe0   :  { %v236_v40 = vmul.f32 -1.442695, %v98_v39  ;;  %v100_v41 = vpop.f32.mrb[1].mxu0 }
  0xe2   :  { %335 = vpow2.f32 %v236_v40 }
  0xe3   :  { %v104_v42 = vpop.f32.mrb[2].mxu0 }
  0xe4   :  { %v237_v43 = vmul.f32 -1.442695, %v104_v42  ;;  %v106_v44 = vpop.f32.mrb[3].mxu0 }
  0xe6   :  { %337 = vpow2.f32 %v237_v43 }
  0xec   :  { %v336_v45 = vpop.eup %335 }
  0xed   :  { %v115_v46 = vadd.f32 1.0, %v336_v45 }
  0xef   :  { %339 = vrcp.f32 %v115_v46 }
  0xf0   :  { %v338_v47 = vpop.eup %337 }
  0xf1   :  { %v116_v48 = vadd.f32 1.0, %v338_v47 }
  0xf3   :  { %341 = vrcp.f32 %v116_v48 }
  0xf9   :  { %v340_v49 = vpop.eup %339 }
  0xfa   :  { %v121_v50 = vmul.f32 %v340_v49, %v98_v39 }
  0xfc   :  { %v123_v51 = vmul.f32 %v121_v50, %v100_v41 }
  0xfd   :  { %v342_v52 = vpop.eup %341 }
  0xfe   :  { %v122_v53 = vmul.f32 %v342_v52, %v104_v42  ;;  %288 = vmatprep.mubr.f32.mxu1 %v123_v51 }
 0x100   :  { %v124_v54 = vmul.f32 %v122_v53, %v106_v44 }
 0x102   :  { %289 = vmatmul.mubr.f32.vlgmr.msra.gmra.mrb[0].mxu1 %v124_v54 }
 0x1d5   :  { %v290_v55 = vpop.f32.mrb[0].mxu1 }
 0x1d6   :  { %217 = vst.msk [vmem:[#allocation2 + $0x8] sm:$0xff] %vm25_vm0, %v290_v55  ;;  %v207_v56 = vpop.f32.mrb[1].mxu1 }
 0x1d7   :  { %216 = vst.msk [vmem:[#allocation2] sm:$0xff] %vm25_vm0, %v207_v56 }
 0x1d8   :  { %354 = shalt.err (!%p351_p4)
}
 0x1d9   :  { %s355_s11 = scalar_lea.hbm %s488_s3, 256 }
 0x1da   :  { %p356_p5 = scmp.ne.s32.totalorder %s488_s3, %s355_s11  ;;  %p359_p6 = scmp.lt.u32.totalorder %s355_s11, %s488_s3 }
 0x1dc   :  { %p361_p7 = pnand %p359_p6, %p356_p5 }
 0x1de   :  { %364 = shalt.err (!%p361_p7)
}
 0x1df   :  { %s369_s15 = smov 128   ;;  %s370_s16 = smov 8  }
 0x1e0   :  { %229 = dma.vmem_to_hbm [thread:$0]  %s224_s7, 256, %s488_s3, [#allocation3], %s369_s15, %s369_s15, %s370_s16  }
 0x1e1   :  { %365 = dma.done.wait [#allocation3], 256  }
 0x1e2   :  { %366 = vsyncadd [#allocation3], 4294967040 }
 0x1e3   :  { %233 = vsyncpa [#allocation3], 1 }

</bundles_post_ra>
